<compile_context>
chip_gen: v6e
topology: v6e:2x2x1
jax: 0.10.0
libtpu: 0.0.40
codegen_flags: <defaults>
</compile_context>

<pallas_src>
import functools

import jax
import jax.numpy as jnp
from jax.experimental import pallas as pl
from jax.experimental.pallas import tpu as pltpu

EPS = 1e-5  # NodeBN eps


# -------------------- fused Pallas kernel --------------------

def _fused_gcn_bn_relu_kernel(ai_ref, x_ref, w1_ref, b1_ref, w2_ref, bn_ref,
                              o_ref):
    # ai_ref : (Np, Np)     A + I, UNNORMALIZED (small ints -> exact in bf16)
    # x_ref  : (Np, Cin_p)  node features (compute dtype)
    # w1_ref : (Cin_p, H_p) / w2_ref: (H_p, Cout_p)   (compute dtype)
    # b1_ref : (1, H_p) f32
    # bn_ref : (2, Cout_p) f32  — row 0 = bn_scale, row 1 = bn_shift (b2 folded)
    # o_ref  : (Np, Cout_p) f32
    cdt = x_ref.dtype                      # bf16 (v6e/v7x fast path) or f32
    ai = ai_ref[...]

    # ---- GCN normalization fused in-kernel (f32 on XLU/EUP/VPU) ----
    # deg includes the self-loop; padded rows have deg 0 -> scale 0.
    deg = jnp.sum(ai.astype(jnp.float32), axis=1, keepdims=True)    # (Np, 1)
    dis = jnp.where(deg > 0.0, jax.lax.rsqrt(deg), 0.0)             # D^{-1/2}
    # A_hat @ M == dis * ((A + I) @ (dis * M))  — scaling stays in f32.

    # ---- GCNConv 1: h1 = A_hat @ (X @ W1) + b1   (f32 accumulation) ----
    xw = jnp.dot(x_ref[...], w1_ref[...], preferred_element_type=jnp.float32)
    h1 = dis * jnp.dot(ai, (dis * xw).astype(cdt),
                       preferred_element_type=jnp.float32) + b1_ref[...]

    # ---- GCNConv 2 matmuls (conv-2 bias folded into the BN shift) ----
    hw = jnp.dot(h1.astype(cdt), w2_ref[...], preferred_element_type=jnp.float32)
    h2 = dis * jnp.dot(ai, (dis * hw).astype(cdt),
                       preferred_element_type=jnp.float32)

    # ---- folded NodeBN affine + ReLU (VPU, f32) ----
    o_ref[...] = jnp.maximum(h2 * bn_ref[0:1, :] + bn_ref[1:2, :], 0.0)


# -------------------- helpers --------------------

def _round_up(n, m):
    return ((n + m - 1) // m) * m


def _pad2(x, rows, cols):
    return jnp.pad(x, ((0, rows - x.shape[0]), (0, cols - x.shape[1])))


def _build_a_plus_i(edge_index, num_nodes):
    # TODO(synk): edge-list scatter (dense adjacency build) stays in plain JAX;
    # Pallas TPU has no clean dynamic 2-D scatter primitive.  It fuses into the
    # surrounding jit, so there is no extra dispatch/HBM round-trip.
    src, dst = edge_index[0], edge_index[1]
    a = jnp.zeros((num_nodes, num_nodes), jnp.float32)
    a = a.at[dst, src].add(1.0)                       # message j -> i at row i
    return a + jnp.eye(num_nodes, dtype=jnp.float32)  # add self-loops


def _mxu_prefers_bf16():
    # bf16 only pays off on the 256-wide bf16-native MXUs (v6e / v7x).
    try:
        kind = jax.devices()[0].device_kind.lower()
    except Exception:
        return False
    return ("v6" in kind) or ("v7" in kind)


# -------------------- wrapper (jitted) --------------------

@functools.partial(jax.jit, static_argnames=("use_bf16",))
def _graph_conv_bn_forward_impl(params, x, edge_index, *, use_bf16):
    num_nodes, in_ch = x.shape
    hid_ch = params["w1"].shape[1]
    out_ch = params["w2"].shape[1]

    ai = _build_a_plus_i(edge_index, num_nodes)

    # bf16 packs 16 rows per sublane group -> pad node axis to 16 on that path.
    n_p = _round_up(num_nodes, 16 if use_bf16 else 8)
    cin_p = _round_up(in_ch, 128)
    hid_p = _round_up(hid_ch, 128)
    out_p = _round_up(out_ch, 128)

    cdt = jnp.bfloat16 if use_bf16 else jnp.float32
    itemsize = 2 if use_bf16 else 4

    ai_pad = _pad2(ai, n_p, n_p).astype(cdt)      # small ints: exact in bf16
    x_pad = _pad2(x, n_p, cin_p).astype(cdt)
    w1_pad = _pad2(params["w1"], cin_p, hid_p).astype(cdt)
    w2_pad = _pad2(params["w2"], hid_p, out_p).astype(cdt)
    b1_pad = _pad2(params["b1"], 1, hid_p)

    # Fold BN (inference, running stats) + conv-2 bias into scale/shift (f32).
    bn_scale = params["bn_gamma"] * jax.lax.rsqrt(params["bn_var"] + EPS)
    bn_shift = params["bn_beta"] + (params["b2"] - params["bn_mean"]) * bn_scale
    bn_pad = _pad2(jnp.concatenate([bn_scale, bn_shift], axis=0), 2, out_p)

    # VMEM scaling guard (full-array-resident design; v7x has the least VMEM).
    in_bytes = ((ai_pad.size + x_pad.size + w1_pad.size + w2_pad.size) * itemsize
                + (b1_pad.size + bn_pad.size) * 4)
    out_bytes = n_p * out_p * 4
    if in_bytes + out_bytes > 24 * 1024 * 1024:
        # TODO(synk): for large graphs, tile the adjacency matmuls with a
        # (tm, tk) BlockSpec + reduction grid axis instead of raising.
        raise ValueError("graph too large for full-VMEM-resident kernel")

    flops = 2 * (n_p * cin_p * hid_p + n_p * n_p * hid_p
                 + n_p * hid_p * out_p + n_p * n_p * out_p)

    vmem = pl.BlockSpec(memory_space=pltpu.MemorySpace.VMEM)
    y = pl.pallas_call(
        _fused_gcn_bn_relu_kernel,
        out_shape=jax.ShapeDtypeStruct((n_p, out_p), jnp.float32),
        in_specs=[vmem] * 6,
        out_specs=vmem,
        cost_estimate=pl.CostEstimate(
            flops=flops,
            transcendentals=n_p,                       # in-kernel rsqrt(deg)
            bytes_accessed=in_bytes + out_bytes),
    )(ai_pad, x_pad, w1_pad, b1_pad, w2_pad, bn_pad)

    return y[:num_nodes, :out_ch]


def graph_conv_bn_forward(params, x, edge_index, *, use_bf16=None):
    """x: (N, in_ch) f32, edge_index: (2, E) int32 -> (N, out_ch) f32."""
    if use_bf16 is None:
        use_bf16 = _mxu_prefers_bf16()
    return _graph_conv_bn_forward_impl(params, x, edge_index,
                                       use_bf16=bool(use_bf16))


# -------------------- parameters --------------------

def init_params(key, in_ch, hid_ch, out_ch):
    ks = jax.random.split(key, 8)
    w1 = jax.random.normal(ks[0], (in_ch, hid_ch), jnp.float32) / (in_ch ** 0.5)
    b1 = 0.1 * jax.random.normal(ks[1], (1, hid_ch), jnp.float32)
    w2 = jax.random.normal(ks[2], (hid_ch, out_ch), jnp.float32) / (hid_ch ** 0.5)
    b2 = 0.1 * jax.random.normal(ks[3], (1, out_ch), jnp.float32)
    # TODO(synk): NodeBN training-mode batch statistics / running-stat updates
    # are not implemented; this is inference-mode BN with running stats.
    bn_gamma = 1.0 + 0.1 * jax.random.normal(ks[4], (1, out_ch), jnp.float32)
    bn_beta = 0.1 * jax.random.normal(ks[5], (1, out_ch), jnp.float32)
    bn_mean = 0.1 * jax.random.normal(ks[6], (1, out_ch), jnp.float32)
    bn_var = 0.5 + jax.random.uniform(ks[7], (1, out_ch), jnp.float32)
    return dict(w1=w1, b1=b1, w2=w2, b2=b2, bn_gamma=bn_gamma, bn_beta=bn_beta,
                bn_mean=bn_mean, bn_var=bn_var)


# -------------------- pure-JAX reference --------------------

def _forward_ref(params, x, edge_index):
    ai = _build_a_plus_i(edge_index, x.shape[0])
    dis = jax.lax.rsqrt(jnp.sum(ai, axis=1))          # deg >= 1 always
    a_hat = ai * dis[:, None] * dis[None, :]
    hp = jax.lax.Precision.HIGHEST
    h1 = jnp.dot(a_hat, jnp.dot(x, params["w1"], precision=hp),
                 precision=hp) + params["b1"]
    h2 = jnp.dot(a_hat, jnp.dot(h1, params["w2"], precision=hp),
                 precision=hp) + params["b2"]
    y = (h2 - params["bn_mean"]) * jax.lax.rsqrt(params["bn_var"] + EPS) \
        * params["bn_gamma"] + params["bn_beta"]
    return jnp.maximum(y, 0.0)


# -------------------- main --------------------

if __name__ == "__main__":
    key = jax.random.PRNGKey(0)
    k_x, k_e1, k_e2, k_p = jax.random.split(key, 4)

    NUM_NODES, IN_CH, HID_CH, OUT_CH, NUM_EDGES = 16, 8, 16, 32, 24

    x = jax.random.normal(k_x, (NUM_NODES, IN_CH), jnp.float32)
    src = jax.random.randint(k_e1, (NUM_EDGES,), 0, NUM_NODES, dtype=jnp.int32)
    off = jax.random.randint(k_e2, (NUM_EDGES,), 1, NUM_NODES, dtype=jnp.int32)
    dst = (src + off) % NUM_NODES                 # no self-loops by construction
    edge_index = jnp.stack([src, dst]).astype(jnp.int32)   # PyG (source, target)

    params = init_params(k_p, IN_CH, HID_CH, OUT_CH)

    ref = jax.block_until_ready(_forward_ref(params, x, edge_index))

    # f32 MXU path: tight correctness check.
    out_f32 = jax.block_until_ready(
        graph_conv_bn_forward(params, x, edge_index, use_bf16=False))
    assert out_f32.shape == (NUM_NODES, OUT_CH), out_f32.shape
    if not jnp.allclose(out_f32, ref, atol=1e-3, rtol=1e-3):
        raise AssertionError("f32 Pallas output does not match JAX reference")

    # bf16 MXU path (fast path on v6e/v7x): deliberately looser check —
    # X/W/intermediate bf16 rounding is ~0.4% relative; A+I and the D^{-1/2}
    # scaling stay exact/f32 in this version.
    out_bf16 = jax.block_until_ready(
        graph_conv_bn_forward(params, x, edge_index, use_bf16=True))
    assert out_bf16.shape == (NUM_NODES, OUT_CH), out_bf16.shape
    if not jnp.allclose(out_bf16, ref, atol=5e-2, rtol=5e-2):
        raise AssertionError("bf16 Pallas output does not match JAX reference")

    # Auto-selected per-chip path (what a user would call).
    out_auto = jax.block_until_ready(graph_conv_bn_forward(params, x, edge_index))
    assert out_auto.shape == (NUM_NODES, OUT_CH), out_auto.shape
    if not jnp.allclose(out_auto, ref, atol=5e-2, rtol=5e-2):
        raise AssertionError("auto-path Pallas output does not match JAX reference")

    print("KERNEL_OK")
</pallas_src>

<mosaic_0001>
module attributes {stable_mosaic.version = 11 : i64} {
  func.func private @main(%arg0: i32) attributes {dimension_semantics = [#tpu.dimension_semantics<core_parallel>], iteration_bounds = array<i64: 2>, tpu.core_type = #tpu.core_type<sc_scalar_subcore>, window_params = []} {
    return
  }
}

module attributes {stable_mosaic.version = 11 : i64} {
  func.func private @main(%arg0: i32) attributes {dimension_semantics = [#tpu.dimension_semantics<core_parallel>], iteration_bounds = array<i64: 2>, tpu.core_type = #tpu.core_type<sc_scalar_subcore>, window_params = []} {
    return
  }
}

module attributes {stable_mosaic.version = 11 : i64} {
  func.func @_fused_gcn_bn_relu_kernel(%arg0: memref<16x16xf32, #tpu.memory_space<vmem>>, %arg1: memref<16x128xf32, #tpu.memory_space<vmem>>, %arg2: memref<128x128xf32, #tpu.memory_space<vmem>>, %arg3: memref<1x128xf32, #tpu.memory_space<vmem>>, %arg4: memref<128x128xf32, #tpu.memory_space<vmem>>, %arg5: memref<2x128xf32, #tpu.memory_space<vmem>>, %arg6: memref<16x128xf32, #tpu.memory_space<vmem>>) attributes {dimension_semantics = [], scalar_prefetch = 0 : i64, scratch_operands = 0 : i64, tpu.core_type = #tpu.core_type<tc>} {
    %c0 = arith.constant 0 : index
    %c0_0 = arith.constant 0 : index
    %0 = vector.load %arg0[%c0, %c0_0] : memref<16x16xf32, #tpu.memory_space<vmem>>, vector<16x16xf32>
    %cst = arith.constant dense<0.000000e+00> : vector<16xf32>
    %1 = vector.multi_reduction <add>, %0, %cst [1] : vector<16x16xf32> to vector<16xf32>
    %2 = vector.shape_cast %1 : vector<16xf32> to vector<16x1xf32>
    %cst_1 = arith.constant 0.000000e+00 : f32
    %3 = vector.broadcast %cst_1 : f32 to vector<16x1xf32>
    %4 = arith.cmpf ogt, %2, %3 : vector<16x1xf32>
    %5 = math.rsqrt %2 : vector<16x1xf32>
    %cst_2 = arith.constant 0.000000e+00 : f32
    %6 = vector.broadcast %cst_2 : f32 to vector<16x1xf32>
    %7 = arith.select %4, %5, %6 : vector<16x1xi1>, vector<16x1xf32>
    %c0_3 = arith.constant 0 : index
    %c0_4 = arith.constant 0 : index
    %8 = vector.load %arg1[%c0_3, %c0_4] : memref<16x128xf32, #tpu.memory_space<vmem>>, vector<16x128xf32>
    %c0_5 = arith.constant 0 : index
    %c0_6 = arith.constant 0 : index
    %9 = vector.load %arg2[%c0_5, %c0_6] : memref<128x128xf32, #tpu.memory_space<vmem>>, vector<128x128xf32>
    %cst_7 = arith.constant dense<0.000000e+00> : vector<16x128xf32>
    %10 = tpu.matmul %8, %9, %cst_7 {dimension_numbers = #tpu.dot_dimension_numbers<[1], [0], [0], [1], [0, 0, 1, 1], [], []>} : vector<16x128xf32>, vector<128x128xf32>, vector<16x128xf32> -> vector<16x128xf32>
    %11 = vector.broadcast %7 : vector<16x1xf32> to vector<16x128xf32>
    %12 = arith.mulf %11, %10 : vector<16x128xf32>
    %cst_8 = arith.constant dense<0.000000e+00> : vector<16x128xf32>
    %13 = tpu.matmul %0, %12, %cst_8 {dimension_numbers = #tpu.dot_dimension_numbers<[1], [0], [0], [1], [0, 0, 1, 1], [], []>} : vector<16x16xf32>, vector<16x128xf32>, vector<16x128xf32> -> vector<16x128xf32>
    %14 = vector.broadcast %7 : vector<16x1xf32> to vector<16x128xf32>
    %15 = arith.mulf %14, %13 : vector<16x128xf32>
    %c0_9 = arith.constant 0 : index
    %c0_10 = arith.constant 0 : index
    %16 = vector.load %arg3[%c0_9, %c0_10] : memref<1x128xf32, #tpu.memory_space<vmem>>, vector<1x128xf32>
    %17 = vector.broadcast %16 : vector<1x128xf32> to vector<16x128xf32>
    %18 = arith.addf %15, %17 : vector<16x128xf32>
    %c0_11 = arith.constant 0 : index
    %c0_12 = arith.constant 0 : index
    %19 = vector.load %arg4[%c0_11, %c0_12] : memref<128x128xf32, #tpu.memory_space<vmem>>, vector<128x128xf32>
    %cst_13 = arith.constant dense<0.000000e+00> : vector<16x128xf32>
    %20 = tpu.matmul %18, %19, %cst_13 {dimension_numbers = #tpu.dot_dimension_numbers<[1], [0], [0], [1], [0, 0, 1, 1], [], []>} : vector<16x128xf32>, vector<128x128xf32>, vector<16x128xf32> -> vector<16x128xf32>
    %21 = vector.broadcast %7 : vector<16x1xf32> to vector<16x128xf32>
    %22 = arith.mulf %21, %20 : vector<16x128xf32>
    %cst_14 = arith.constant dense<0.000000e+00> : vector<16x128xf32>
    %23 = tpu.matmul %0, %22, %cst_14 {dimension_numbers = #tpu.dot_dimension_numbers<[1], [0], [0], [1], [0, 0, 1, 1], [], []>} : vector<16x16xf32>, vector<16x128xf32>, vector<16x128xf32> -> vector<16x128xf32>
    %24 = vector.broadcast %7 : vector<16x1xf32> to vector<16x128xf32>
    %25 = arith.mulf %24, %23 : vector<16x128xf32>
    %c0_15 = arith.constant 0 : index
    %c0_16 = arith.constant 0 : index
    %26 = vector.load %arg5[%c0_15, %c0_16] : memref<2x128xf32, #tpu.memory_space<vmem>>, vector<1x128xf32>
    %27 = vector.broadcast %26 : vector<1x128xf32> to vector<16x128xf32>
    %28 = arith.mulf %25, %27 : vector<16x128xf32>
    %c1 = arith.constant 1 : index
    %c0_17 = arith.constant 0 : index
    %29 = vector.load %arg5[%c1, %c0_17] : memref<2x128xf32, #tpu.memory_space<vmem>>, vector<1x128xf32>
    %30 = vector.broadcast %29 : vector<1x128xf32> to vector<16x128xf32>
    %31 = arith.addf %28, %30 : vector<16x128xf32>
    %cst_18 = arith.constant 0.000000e+00 : f32
    %32 = vector.broadcast %cst_18 : f32 to vector<16x128xf32>
    %33 = arith.maximumf %31, %32 : vector<16x128xf32>
    %c0_19 = arith.constant 0 : index
    %c0_20 = arith.constant 0 : index
    %34 = vector.load %arg6[%c0_19, %c0_20] : memref<16x128xf32, #tpu.memory_space<vmem>>, vector<16x128xf32>
    tpu.vector_store %arg6[%c0_19, %c0_20], %33 {strides = array<i32>} : memref<16x128xf32, #tpu.memory_space<vmem>>, vector<16x128xf32>,
    return
  }
}

</mosaic_0001>

<bundles_post_ra>
// kernel: _graph_conv_bn_forward_impl.1
= control target key start
LH: loop header
LB: loop body
LE: loop exit
PB: predicated region body
PF: predicated region fallthrough
CT: control target
= control target key end

     0   :  { %11 = vsyncpa [#allocation3], 0  ;;  %s817_s0 = inlined_call_operand.hbm [shape: f32[16,16], index: 0, kind: input, shape index: {}]   ;;  %s818_s1 = inlined_call_operand.vmem [shape: f32[16,128], index: 1, kind: input, shape index: {}]   ;;  %s819_s2 = inlined_call_operand.vmem [shape: f32[128,128], index: 2, kind: input, shape index: {}]   ;;  %s820_s3 = inlined_call_operand.vmem [shape: f32[1,128], index: 3, kind: input, shape index: {}]   ;;  %s821_s4 = inlined_call_operand.vmem [shape: f32[128,128], index: 4, kind: input, shape index: {}]   ;;  %s822_s5 = inlined_call_operand.vmem [shape: f32[2,128], index: 5, kind: input, shape index: {}]   ;;  %s823_s6 = inlined_call_operand.hbm [shape: f32[16,128], index: 6, kind: output, shape index: {}]  }
   0x1   :  { %12 = vsyncpa [#allocation4], 0  ;;  %s632_s21 = smov [#allocation2]  }
   0x2   :  { %s18_s22 = sshll.u32 %s632_s21, 4  ;;  %s19_s22 = int_to_ptr.vmem [resolvable:$true] %s18_s22 }
   0x3   :  { %s596_s23 = scalar_lea.vmem %s19_s22, 256  ;;  %p601_p1 = scmp.lt.s32.totalorder %s19_s22, %s19_s22 }
   0x4   :  { %p597_p0 = scmp.ne.s32.totalorder %s19_s22, %s596_s23  ;;  %p602_p2 = scmp.lt.s32.totalorder %s596_s23, %s596_s23 }
   0x6   :  { %p603_p3 = por %p602_p2, %p601_p1 }
   0x8   :  { %p604_p4 = pnand %p603_p3, %p597_p0 }
   0xa   :  { %607 = shalt.err (!%p604_p4)
}
   0xb   :  { %s633_s24 = smov 128   ;;  %s634_s25 = smov 8  }
   0xc   :  { %24 = dma.hbm_to_vmem [thread:$0]  %s817_s0, 256, %s19_s22, [#allocation3], %s633_s24, %s633_s24, %s634_s25  }
   0xd   :  { %628 = dma.done.wait [#allocation3], 256  }
   0xe   :  { %629 = vsyncadd [#allocation3], 4294967040  ;;  %v70_v0 = vld [vmem:[%s819_s2 + $0x78] sm:$0xff]  ;;  %v69_v1 = vld [vmem:[%s819_s2 + $0x70] sm:$0xff]  ;;  %vm40_vm0 = vcmask 130048   ;;  %s635_s27 = smov [#allocation5]  }
   0xf   :  { %496 = vmatprep.subr.mxu0 %v70_v0  ;;  %v68_v2 = vld [vmem:[%s819_s2 + $0x68] sm:$0xff]  ;;  %v67_v3 = vld [vmem:[%s819_s2 + $0x60] sm:$0xff]  ;;  %v66_v5 = vld [vmem:[%s819_s2 + $0x58] sm:$0xff]  ;;  %s433_s28 = sshll.u32 %s635_s27, 4  ;;  %s434_s28 = int_to_ptr.vmem [resolvable:$true] %s433_s28 }
  0x10   :  { %497 = vmatpush3.msra.mxu0 %v70_v0  ;;  %v53_v4 = vld [vmem:[%s818_s1] sm:$0xff]  ;;  %v695_v6 = vld [vmem:[#allocation2 + $0x8] sm:$0xff]  ;;  %v65_v9 = vld [vmem:[%s819_s2 + $0x50] sm:$0xff]  ;;  %s608_s29 = scalar_lea.vmem %s434_s28, 256  ;;  %p613_p6 = scmp.lt.s32.totalorder %s434_s28, %s434_s28 }
  0x11   :  { %498 = vmatprep.subr.mxu0 %v69_v1  ;;  %528 = vmatprep.mubr.f32.mxu0 %v53_v4  ;;  %v38_v7 = vld [vmem:[#allocation2] sm:$0xff]  ;;  %v44_v8 = vsel %vm40_vm0, %v695_v6, 0.0  ;;  %v64_v11 = vld [vmem:[%s819_s2 + $0x48] sm:$0xff]  ;;  %v62_v13 = vld [vmem:[%s819_s2 + $0x38] sm:$0xff]  ;;  %p609_p5 = scmp.ne.s32.totalorder %s434_s28, %s608_s29  ;;  %p614_p7 = scmp.lt.s32.totalorder %s608_s29, %s608_s29 }
  0x12   :  { %499 = vmatpush3.msra.mxu0 %v69_v1  ;;  %535 = vmatprep.mubr.msk.f32.mxu1 %vm40_vm0, %v38_v7  ;;  %v41_v10 = vsel %vm40_vm0, %v38_v7, 0.0  ;;  %v63_v12 = vld [vmem:[%s819_s2 + $0x40] sm:$0xff]  ;;  %v61_v14 = vld [vmem:[%s819_s2 + $0x30] sm:$0xff]  ;;  %v60_v15 = vld [vmem:[%s819_s2 + $0x28] sm:$0xff] }
  0x13   :  { %500 = vmatprep.subr.mxu0 %v68_v2  ;;  %45 = vadd.xlane.f32.xlu0 %v44_v8  ;;  %v59_v16 = vld [vmem:[%s819_s2 + $0x20] sm:$0xff]  ;;  %v58_v17 = vld [vmem:[%s819_s2 + $0x18] sm:$0xff]  ;;  %v57_v18 = vld [vmem:[%s819_s2 + $0x10] sm:$0xff]  ;;  %p615_p8 = por %p614_p7, %p613_p6 }
  0x14   :  { %501 = vmatpush3.msra.mxu0 %v68_v2  ;;  %v56_v19 = vld [vmem:[%s819_s2 + $0x8] sm:$0xff]  ;;  %v55_v20 = vld [vmem:[%s819_s2] sm:$0xff]  ;;  %v255_v32 = vld [vmem:[%s821_s4 + $0x78] sm:$0xff] }
  0x15   :  { %502 = vmatprep.subr.mxu0 %v67_v3  ;;  %v54_v21 = vld [vmem:[%s818_s1 + $0x8] sm:$0xff]  ;;  %v254_v33 = vld [vmem:[%s821_s4 + $0x70] sm:$0xff]  ;;  %v252_v35 = vld [vmem:[%s821_s4 + $0x60] sm:$0xff]  ;;  %p616_p9 = pnand %p615_p8, %p609_p5 }
  0x16   :  { %503 = vmatpush3.msra.mxu0 %v67_v3  ;;  %v253_v34 = vld [vmem:[%s821_s4 + $0x68] sm:$0xff]  ;;  %v251_v36 = vld [vmem:[%s821_s4 + $0x58] sm:$0xff]  ;;  %v250_v37 = vld [vmem:[%s821_s4 + $0x50] sm:$0xff] }
  0x17   :  { %504 = vmatprep.subr.mxu0 %v66_v5  ;;  %42 = vadd.xlane.f32.xlu0 %v41_v10  ;;  %v249_v38 = vld [vmem:[%s821_s4 + $0x48] sm:$0xff]  ;;  %v248_v39 = vld [vmem:[%s821_s4 + $0x40] sm:$0xff]  ;;  %v247_v40 = vld [vmem:[%s821_s4 + $0x38] sm:$0xff] }
  0x18   :  { %505 = vmatpush3.msra.mxu0 %v66_v5  ;;  %v246_v41 = vld [vmem:[%s821_s4 + $0x30] sm:$0xff]  ;;  %v245_v42 = vld [vmem:[%s821_s4 + $0x28] sm:$0xff]  ;;  %v244_v43 = vld [vmem:[%s821_s4 + $0x20] sm:$0xff] }
  0x19   :  { %506 = vmatprep.subr.mxu0 %v65_v9  ;;  %v243_v44 = vld [vmem:[%s821_s4 + $0x18] sm:$0xff]  ;;  %v242_v45 = vld [vmem:[%s821_s4 + $0x10] sm:$0xff]  ;;  %v241_v46 = vld [vmem:[%s821_s4 + $0x8] sm:$0xff] }
  0x1a   :  { %507 = vmatpush3.msra.mxu0 %v65_v9  ;;  %v240_v47 = vld [vmem:[%s821_s4] sm:$0xff] }
  0x1b   :  { %508 = vmatprep.subr.mxu0 %v64_v11  ;;  %v447_v51 = vld [vmem:[%s820_s3] ss:$0 sm:$0xff]  ;;  %v451_v62 = vld [vmem:[%s822_s5 + $0x1] ss:$0 sm:$0xff] }
  0x1c   :  { %509 = vmatpush3.msra.mxu0 %v64_v11  ;;  %v450_v60 = vld [vmem:[%s822_s5] ss:$0 sm:$0xff] }
  0x1d   :  { %510 = vmatprep.subr.mxu0 %v63_v12 }
  0x1e   :  { %511 = vmatpush3.msra.mxu0 %v63_v12 }
  0x1f   :  { %512 = vmatprep.subr.mxu0 %v62_v13 }
  0x20   :  { %513 = vmatpush3.msra.mxu0 %v62_v13 }
  0x21   :  { %514 = vmatprep.subr.mxu0 %v61_v14 }
  0x22   :  { %515 = vmatpush3.msra.mxu0 %v61_v14 }
  0x23   :  { %516 = vmatprep.subr.mxu0 %v60_v15 }
  0x24   :  { %517 = vmatpush3.msra.mxu0 %v60_v15 }
  0x25   :  { %518 = vmatprep.subr.mxu0 %v59_v16 }
  0x26   :  { %519 = vmatpush3.msra.mxu0 %v59_v16 }
  0x27   :  { %520 = vmatprep.subr.mxu0 %v58_v17 }
  0x28   :  { %521 = vmatpush3.msra.mxu0 %v58_v17 }
  0x29   :  { %522 = vmatprep.subr.mxu0 %v57_v18 }
  0x2a   :  { %523 = vmatpush3.msra.mxu0 %v57_v18 }
  0x2b   :  { %524 = vmatprep.subr.mxu0 %v56_v19 }
  0x2c   :  { %525 = vmatpush3.msra.mxu0 %v56_v19 }
  0x2d   :  { %526 = vmatprep.subr.mxu0 %v55_v20 }
  0x2e   :  { %527 = vmatpush3.msra.mxu0 %v55_v20 }
  0x2f   :  { %529 = vmatmul.mubr.f32.vlgmr.msra.gmra.mxu0 %v54_v21 }
  0x30   :  { %577 = vmatprep.mubr.msk.f32.mxu0 %vm40_vm0, %v38_v7 }
  0x9c   :  { %v46_v22 = vpop.xlane.xlu0 %45 }
  0x9d   :  { %584 = vrsqrt.f32 %v46_v22  ;;  %vm48_vm1 = vcmp.gt.f32.partialorder %v46_v22, 0.0 }
  0xa0   :  { %v43_v23 = vpop.xlane.xlu0 %42 }
  0xa1   :  { %586 = vrsqrt.f32 %v43_v23  ;;  %vm47_vm2 = vcmp.gt.f32.partialorder %v43_v23, 0.0 }
  0xaa   :  { %v585_v24 = vpop.eup %584 }
  0xab   :  { %v738_v26 = vsel %vm48_vm1, %v585_v24, 0.0 }
  0xae   :  { %v587_v25 = vpop.eup %586 }
  0xaf   :  { %v741_v29 = vsel %vm47_vm2, %v587_v25, 0.0 }
  0xef   :  { %v530_v27 = vpop.f32.mrf.mxu0 }
  0xf0   :  { %v147_v28 = vmul.f32 %v530_v27, %v738_v26 }
  0xf1   :  { %v137_v30 = vpop.f32.mrf.mxu0 }
  0xf2   :  { %v146_v31 = vmul.f32 %v137_v30, %v741_v29  ;;  %531 = vmatprep.subr.mxu1 %v147_v28 }
  0xf3   :  { %532 = vmatpush3.msra.mxu1 %v147_v28 }
  0xf4   :  { %533 = vmatprep.subr.mxu1 %v146_v31 }
  0xf5   :  { %534 = vmatpush3.msra.mxu1 %v146_v31 }
  0xf6   :  { %536 = vmatmul.mubr.msk.f32.vlgmr.msra.gmra.mxu1 %vm40_vm0, %v695_v6  ;;  %538 = vmatprep.subr.mxu1 %v255_v32 }
  0xf7   :  { %539 = vmatpush3.msra.mxu1 %v255_v32 }
  0xf8   :  { %540 = vmatprep.subr.mxu1 %v254_v33 }
  0xf9   :  { %541 = vmatpush3.msra.mxu1 %v254_v33 }
  0xfa   :  { %542 = vmatprep.subr.mxu1 %v253_v34 }
  0xfb   :  { %543 = vmatpush3.msra.mxu1 %v253_v34 }
  0xfc   :  { %544 = vmatprep.subr.mxu1 %v252_v35 }
  0xfd   :  { %545 = vmatpush3.msra.mxu1 %v252_v35 }
  0xfe   :  { %546 = vmatprep.subr.mxu1 %v251_v36 }
  0xff   :  { %547 = vmatpush3.msra.mxu1 %v251_v36 }
 0x100   :  { %548 = vmatprep.subr.mxu1 %v250_v37 }
 0x101   :  { %549 = vmatpush3.msra.mxu1 %v250_v37 }
 0x102   :  { %550 = vmatprep.subr.mxu1 %v249_v38 }
 0x103   :  { %551 = vmatpush3.msra.mxu1 %v249_v38 }
 0x104   :  { %552 = vmatprep.subr.mxu1 %v248_v39 }
 0x105   :  { %553 = vmatpush3.msra.mxu1 %v248_v39 }
 0x106   :  { %554 = vmatprep.subr.mxu1 %v247_v40 }
 0x107   :  { %555 = vmatpush3.msra.mxu1 %v247_v40 }
 0x108   :  { %556 = vmatprep.subr.mxu1 %v246_v41 }
 0x109   :  { %557 = vmatpush3.msra.mxu1 %v246_v41 }
 0x10a   :  { %558 = vmatprep.subr.mxu1 %v245_v42 }
 0x10b   :  { %559 = vmatpush3.msra.mxu1 %v245_v42 }
 0x10c   :  { %560 = vmatprep.subr.mxu1 %v244_v43 }
 0x10d   :  { %561 = vmatpush3.msra.mxu1 %v244_v43 }
 0x10e   :  { %562 = vmatprep.subr.mxu1 %v243_v44 }
 0x10f   :  { %563 = vmatpush3.msra.mxu1 %v243_v44 }
 0x110   :  { %564 = vmatprep.subr.mxu1 %v242_v45 }
 0x111   :  { %565 = vmatpush3.msra.mxu1 %v242_v45 }
 0x112   :  { %566 = vmatprep.subr.mxu1 %v241_v46 }
 0x113   :  { %567 = vmatpush3.msra.mxu1 %v241_v46 }
 0x114   :  { %568 = vmatprep.subr.mxu1 %v240_v47 }
 0x115   :  { %569 = vmatpush3.msra.mxu1 %v240_v47 }
 0x1b6   :  { %v537_v48 = vpop.f32.mrf.mxu1 }
 0x1b7   :  { %v230_v49 = vmul.f32 %v537_v48, %v738_v26 }
 0x1b8   :  { %v220_v50 = vpop.f32.mrf.mxu1 }
 0x1b9   :  { %v229_v52 = vmul.f32 %v220_v50, %v741_v29  ;;  %v239_v54 = vadd.f32 %v447_v51, %v230_v49 }
 0x1bb   :  { %v238_v53 = vadd.f32 %v447_v51, %v229_v52 }
 0x1bd   :  { %570 = vmatprep.mubr.f32.mxu1 %v238_v53 }
 0x1be   :  { %571 = vmatmul.mubr.f32.vlgmr.msra.gmra.mxu1 %v239_v54 }
 0x27e   :  { %v572_v55 = vpop.f32.mrf.mxu1 }
 0x27f   :  { %v332_v56 = vmul.f32 %v572_v55, %v738_v26 }
 0x280   :  { %v322_v57 = vpop.f32.mrf.mxu1 }
 0x281   :  { %v331_v58 = vmul.f32 %v322_v57, %v741_v29  ;;  %573 = vmatprep.subr.mxu0 %v332_v56 }
 0x282   :  { %574 = vmatpush3.msra.mxu0 %v332_v56 }
 0x283   :  { %575 = vmatprep.subr.mxu0 %v331_v58 }
 0x284   :  { %576 = vmatpush3.msra.mxu0 %v331_v58 }
 0x285   :  { %578 = vmatmul.mubr.msk.f32.vlgmr.msra.gmra.mxu0 %vm40_vm0, %v695_v6 }
 0x345   :  { %v579_v59 = vpop.f32.mrf.mxu0 }
 0x346   :  { %v409_v61 = vmul.f32 %v579_v59, %v738_v26 }
 0x347   :  { %v399_v63 = vpop.f32.mrf.mxu0 }
 0x348   :  { %v416_v0 = vmul.f32 %v450_v60, %v409_v61  ;;  %v408_v1 = vmul.f32 %v399_v63, %v741_v29 }
 0x34a   :  { %v423_v2 = vadd.f32 %v451_v62, %v416_v0  ;;  %v415_v3 = vmul.f32 %v450_v60, %v408_v1 }
 0x34c   :  { %v425_v4 = vmax.f32 %v423_v2, 0.0  ;;  %v422_v5 = vadd.f32 %v451_v62, %v415_v3 }
 0x34e   :  { %427 = vst [vmem:[#allocation5 + $0x8] sm:$0xff] %v425_v4  ;;  %v424_v6 = vmax.f32 %v422_v5, 0.0 }
 0x350   :  { %426 = vst [vmem:[#allocation5] sm:$0xff] %v424_v6 }
 0x351   :  { %619 = shalt.err (!%p616_p9)
}
 0x352   :  { %439 = dma.vmem_to_hbm [thread:$0]  %s434_s28, 256, %s823_s6, [#allocation4], %s633_s24, %s633_s24, %s634_s25  }
 0x353   :  { %630 = dma.done.wait [#allocation4], 256  }
 0x354   :  { %631 = vsyncadd [#allocation4], 4294967040 }
 0x355   :  { %443 = vsyncpa [#allocation3], 1 }
 0x356   :  { %444 = vsyncpa [#allocation4], 1 }

</bundles_post_ra>
